<compile_context>
chip_gen: v7x
topology: tpu7x:2x2x1
jax: 0.10.0
libtpu: 0.0.40
codegen_flags: <defaults>
</compile_context>

<pallas_src>
import jax
import jax.numpy as jnp
from jax.experimental import pallas as pl
from jax.experimental.pallas import tpu as pltpu


def _rup(n, m):
    return ((n + m - 1) // m) * m


def _num_tensorcores():
    """Best-effort TensorCores per chip: v7x has 2, v5e/v6e have 1."""
    try:
        kind = (getattr(jax.devices()[0], "device_kind", "") or "").lower()
        if "v7" in kind:
            return 2
    except Exception:
        pass
    return 1


def _choose_tm(m_rows, row_align, n_cores, tm_max):
    """Biggest row tile <= tm_max with minimal row padding.

    Single-core chips (v5e/v6e): the grid is a serial loop, so small M gets one
    grid step (no pointless split).  Multi-core (v7x): round the tile count up
    to a multiple of the core count so ("parallel",) shards evenly.
    """
    n_tiles = pl.cdiv(m_rows, tm_max)
    if n_cores > 1:
        n_tiles = _rup(n_tiles, n_cores)
    tm = _rup(pl.cdiv(m_rows, n_tiles), row_align)
    return min(tm, _rup(tm_max, row_align))


# ---------------------------------------------------------------------------
# Fused multi-layer kernel.
#   refs = (x_ref, w0_ref, b0_ref, ..., o_ref, acts_ref)
#   x_ref   : (tm, in_ch)         raw input tile (original dtype / width)
#   wl_ref  : (cum_l, Hp_l)       padded, pre-transposed, segment-stacked W^T
#   bl_ref  : (1, Hp_l)           padded bias (f32)
#   o_ref   : (tm, Hp_last)       lane-dense output tile
#   acts_ref: (tm, Kp+sum(Hp[:-1])) VMEM stacked-activation buffer
# ---------------------------------------------------------------------------
def _make_mlp_kernel(n_layers, in_ch, kp, hp, col_off, compute_dtype):
    def kernel(*refs):
        x_ref = refs[0]
        wb = refs[1:1 + 2 * n_layers]
        o_ref = refs[1 + 2 * n_layers]
        acts_ref = refs[2 + 2 * n_layers]
        tm = x_ref.shape[0]

        # Stage the lane-padded input tile into the stacked activation buffer.
        xv = x_ref[...].astype(compute_dtype)
        if in_ch < kp:
            acts_ref[:, 0:kp] = jnp.zeros((tm, kp), compute_dtype)
            acts_ref[:, 0:in_ch] = xv          # masked store over zeroed slot
        else:
            acts_ref[:, 0:kp] = xv

        out_f32 = None
        for l in range(n_layers):              # static unrolled, tiny L
            w_ref = wb[2 * l]
            b_ref = wb[2 * l + 1]
            cum = col_off[l]                    # contraction width (128-aligned)
            acc = jnp.dot(acts_ref[:, 0:cum], w_ref[...],
                          preferred_element_type=jnp.float32)
            out_f32 = jnp.maximum(acc + b_ref[...], 0.0)   # f32 epilogue (v5e-safe)
            if l + 1 < n_layers:
                # Padded output lanes are exactly zero (zero W/bias pads + ReLU),
                # so storing the full Hp[l] slot keeps the buffer correctly padded.
                acts_ref[:, cum:cum + hp[l]] = out_f32.astype(compute_dtype)
        o_ref[...] = out_f32.astype(o_ref.dtype)

    return kernel


# ---------------------------------------------------------------------------
# Parameter init (deterministic, mirrors nn.Linear default uniform init)
# ---------------------------------------------------------------------------
def init_mlp_params(key, in_ch, hidden_ch):
    params = []
    cur = in_ch
    for h_dim in hidden_ch:
        key, kw, kb = jax.random.split(key, 3)
        bound = 1.0 / (cur ** 0.5)
        w = jax.random.uniform(kw, (h_dim, cur), jnp.float32, -bound, bound)  # torch (out,in)
        b = jax.random.uniform(kb, (h_dim,), jnp.float32, -bound, bound)
        params.append((w, b))
        cur = h_dim + cur  # next layer sees concat([out, x])
    return params


# ---------------------------------------------------------------------------
# One-time weight packing (hoisted out of the forward path).
# Torch layer-l input layout is [out_{l-1}, ..., out_0, x]; split W column-wise
# into those pieces, reorder to the kernel's buffer order [x, out_0, ...],
# transpose each piece and zero-pad it into a 128-aligned block of stacked W^T.
# ---------------------------------------------------------------------------
def prepare_params(params, in_ch, compute_dtype=jnp.bfloat16):
    hidden = [w.shape[0] for (w, _) in params]
    kp = _rup(in_ch, 128)
    hp = [_rup(h, 128) for h in hidden]

    packed = []
    for l, (w, b) in enumerate(params):
        h = hidden[l]
        torch_sizes = list(reversed(hidden[:l])) + [in_ch]
        pieces, off = [], 0
        for s in torch_sizes:
            pieces.append(w[:, off:off + s])
            off += s
        pieces = list(reversed(pieces))          # [x_piece, out_0_piece, ...]
        pad_widths = [kp] + hp[:l]

        blocks = []
        for p, pw in zip(pieces, pad_widths):
            blk = jnp.zeros((pw, hp[l]), compute_dtype)
            blk = blk.at[:p.shape[1], :h].set(jnp.transpose(p).astype(compute_dtype))
            blocks.append(blk)
        wt = jnp.concatenate(blocks, axis=0)                  # (cum_l, Hp_l)
        bt = jnp.zeros((1, hp[l]), jnp.float32).at[0, :h].set(b.astype(jnp.float32))
        packed.append((wt, bt))

    meta = dict(in_ch=in_ch, hidden=hidden, kp=kp, hp=hp, compute_dtype=compute_dtype)
    return packed, meta


# ---------------------------------------------------------------------------
# MLP forward: one fused pallas_call over row tiles
# ---------------------------------------------------------------------------
def mlp_forward(x, packed, meta, *, tm_max=None, out_dtype=None):
    in_ch = meta["in_ch"]
    hidden = meta["hidden"]
    kp = meta["kp"]
    hp = meta["hp"]
    cdt = meta["compute_dtype"]
    n_layers = len(packed)
    assert x.shape[-1] == in_ch

    lead = x.shape[:-1]
    x2d = x.reshape(-1, in_ch)
    M = x2d.shape[0]
    if out_dtype is None:
        out_dtype = cdt                      # bf16 output halves the HBM store stream

    n_cores = _num_tensorcores()
    row_align = max(8, 32 // jnp.dtype(cdt).itemsize)   # f32->8, bf16->16, 8-bit->32
    if tm_max is None:
        tm_max = 1024 if M >= n_cores * 1024 else 512
    tm = _choose_tm(M, row_align, n_cores, tm_max)
    Mp = _rup(M, tm)
    if Mp != M:
        x2d = jnp.pad(x2d, ((0, Mp - M), (0, 0)))        # row pad only; lanes stay in_ch

    col_off = [kp + sum(hp[:l]) for l in range(n_layers)]
    scratch_w = col_off[-1] if n_layers > 1 else kp       # == kp + sum(hp[:-1])

    in_specs = [pl.BlockSpec((tm, in_ch), lambda i: (i, 0))]
    flat_wb = []
    for l in range(n_layers):
        wt, bt = packed[l]
        flat_wb += [wt, bt]
        in_specs += [
            pl.BlockSpec((col_off[l], hp[l]), lambda i: (0, 0)),   # resident weights
            pl.BlockSpec((1, hp[l]), lambda i: (0, 0)),            # resident bias
        ]

    out = pl.pallas_call(
        _make_mlp_kernel(n_layers, in_ch, kp, tuple(hp), tuple(col_off), cdt),
        out_shape=jax.ShapeDtypeStruct((Mp, hp[-1]), out_dtype),
        grid_spec=pltpu.PrefetchScalarGridSpec(
            num_scalar_prefetch=0,
            grid=(Mp // tm,),
            in_specs=in_specs,
            out_specs=pl.BlockSpec((tm, hp[-1]), lambda i: (i, 0)),
            scratch_shapes=[pltpu.VMEM((tm, scratch_w), cdt)],
        ),
        compiler_params=pltpu.CompilerParams(
            dimension_semantics=("parallel",),
        ),
    )(x2d, *flat_wb)

    out = out[:M, :hidden[-1]]
    return out.reshape(*lead, hidden[-1])


# Pure-JAX reference (f32 math) for correctness checking
def mlp_forward_ref(x, params):
    out = None
    for (w, b) in params:
        out = jnp.maximum(x @ jnp.transpose(w) + b, 0.0)
        x = jnp.concatenate([out, x], axis=-1)
    return out


if __name__ == "__main__":
    key = jax.random.PRNGKey(0)
    k_x, k_p = jax.random.split(key)

    in_ch = 16
    hidden_ch = [32, 16]          # two hidden layers to exercise the skip path
    batch, seq = 2, 8             # 16 rows total

    x = jax.random.normal(k_x, (batch, seq, in_ch), jnp.float32)
    params = init_mlp_params(k_p, in_ch, hidden_ch)
    y_ref = mlp_forward_ref(x, params)

    # Exact f32 path (tight tolerance, f32 output).
    packed32, meta32 = prepare_params(params, in_ch, compute_dtype=jnp.float32)
    y_f32 = jax.block_until_ready(mlp_forward(x, packed32, meta32))
    assert y_f32.shape == (batch, seq, hidden_ch[-1]), y_f32.shape
    assert jnp.allclose(y_f32, y_ref, atol=1e-5, rtol=1e-5), "f32 path mismatch"

    # Default bf16-MXU / bf16-output path (loose tolerance), under jit.
    packed16, meta16 = prepare_params(params, in_ch)  # compute_dtype=bfloat16
    fwd = jax.jit(lambda xx: mlp_forward(xx, packed16, meta16))
    y_bf16 = jax.block_until_ready(fwd(x))
    assert y_bf16.shape == (batch, seq, hidden_ch[-1]), y_bf16.shape
    assert y_bf16.dtype == jnp.bfloat16
    assert jnp.allclose(y_bf16.astype(jnp.float32), y_ref, atol=5e-2, rtol=5e-2), \
        "bf16 path mismatch"

    print("KERNEL_OK")
</pallas_src>

<mosaic_0001>
module attributes {stable_mosaic.version = 11 : i64} {
  func.func @kernel(%arg0: i32, %arg1: memref<16x16xf32, #tpu.memory_space<vmem>>, %arg2: memref<128x128xf32, #tpu.memory_space<vmem>>, %arg3: memref<1x128xf32, #tpu.memory_space<vmem>>, %arg4: memref<256x128xf32, #tpu.memory_space<vmem>>, %arg5: memref<1x128xf32, #tpu.memory_space<vmem>>, %arg6: memref<16x128xf32, #tpu.memory_space<vmem>>, %arg7: memref<16x256xf32, #tpu.memory_space<vmem>>) attributes {dimension_semantics = [#tpu.dimension_semantics<parallel>], iteration_bounds = array<i64: 1>, scalar_prefetch = 0 : i64, scratch_operands = 1 : i64, tpu.core_type = #tpu.core_type<tc>, window_params = [{transform_indices = @transform_0, window_bounds = array<i64: 16, 16>}, {pipeline_mode = #tpu.pipeline_mode<synchronous>, transform_indices = @transform_1, window_bounds = array<i64: 128, 128>}, {pipeline_mode = #tpu.pipeline_mode<synchronous>, transform_indices = @transform_2, window_bounds = array<i64: 1, 128>}, {pipeline_mode = #tpu.pipeline_mode<synchronous>, transform_indices = @transform_3, window_bounds = array<i64: 256, 128>}, {pipeline_mode = #tpu.pipeline_mode<synchronous>, transform_indices = @transform_4, window_bounds = array<i64: 1, 128>}, {transform_indices = @transform_5, window_bounds = array<i64: 16, 128>}]} {
    %c0 = arith.constant 0 : index
    %c0_0 = arith.constant 0 : index
    %0 = vector.load %arg1[%c0, %c0_0] : memref<16x16xf32, #tpu.memory_space<vmem>>, vector<16x16xf32>
    %cst = arith.constant 0.000000e+00 : f32
    %1 = vector.broadcast %cst : f32 to vector<16x128xf32>
    %c0_1 = arith.constant 0 : index
    %c0_2 = arith.constant 0 : index
    %2 = vector.load %arg7[%c0_1, %c0_2] : memref<16x256xf32, #tpu.memory_space<vmem>>, vector<16x128xf32>
    tpu.vector_store %arg7[%c0_1, %c0_2], %1 {strides = array<i32>} : memref<16x256xf32, #tpu.memory_space<vmem>>, vector<16x128xf32>,
    %c0_3 = arith.constant 0 : index
    %c0_4 = arith.constant 0 : index
    %3 = vector.load %arg7[%c0_3, %c0_4] : memref<16x256xf32, #tpu.memory_space<vmem>>, vector<16x16xf32>
    tpu.vector_store %arg7[%c0_3, %c0_4], %0 {strides = array<i32>} : memref<16x256xf32, #tpu.memory_space<vmem>>, vector<16x16xf32>,
    %c0_5 = arith.constant 0 : index
    %c0_6 = arith.constant 0 : index
    %4 = vector.load %arg7[%c0_5, %c0_6] : memref<16x256xf32, #tpu.memory_space<vmem>>, vector<16x128xf32>
    %c0_7 = arith.constant 0 : index
    %c0_8 = arith.constant 0 : index
    %5 = vector.load %arg2[%c0_7, %c0_8] : memref<128x128xf32, #tpu.memory_space<vmem>>, vector<128x128xf32>
    %cst_9 = arith.constant dense<0.000000e+00> : vector<16x128xf32>
    %6 = tpu.matmul %4, %5, %cst_9 {dimension_numbers = #tpu.dot_dimension_numbers<[1], [0], [0], [1], [0, 0, 1, 1], [], []>} : vector<16x128xf32>, vector<128x128xf32>, vector<16x128xf32> -> vector<16x128xf32>
    %c0_10 = arith.constant 0 : index
    %c0_11 = arith.constant 0 : index
    %7 = vector.load %arg3[%c0_10, %c0_11] : memref<1x128xf32, #tpu.memory_space<vmem>>, vector<1x128xf32>
    %8 = vector.broadcast %7 : vector<1x128xf32> to vector<16x128xf32>
    %9 = arith.addf %6, %8 : vector<16x128xf32>
    %cst_12 = arith.constant 0.000000e+00 : f32
    %10 = vector.broadcast %cst_12 : f32 to vector<16x128xf32>
    %11 = arith.maximumf %9, %10 : vector<16x128xf32>
    %c0_13 = arith.constant 0 : index
    %c128 = arith.constant 128 : index
    %12 = vector.load %arg7[%c0_13, %c128] : memref<16x256xf32, #tpu.memory_space<vmem>>, vector<16x128xf32>
    tpu.vector_store %arg7[%c0_13, %c128], %11 {strides = array<i32>} : memref<16x256xf32, #tpu.memory_space<vmem>>, vector<16x128xf32>,
    %c0_14 = arith.constant 0 : index
    %c0_15 = arith.constant 0 : index
    %13 = vector.load %arg7[%c0_14, %c0_15] : memref<16x256xf32, #tpu.memory_space<vmem>>, vector<16x256xf32>
    %c0_16 = arith.constant 0 : index
    %c0_17 = arith.constant 0 : index
    %14 = vector.load %arg4[%c0_16, %c0_17] : memref<256x128xf32, #tpu.memory_space<vmem>>, vector<256x128xf32>
    %cst_18 = arith.constant dense<0.000000e+00> : vector<16x128xf32>
    %15 = tpu.matmul %13, %14, %cst_18 {dimension_numbers = #tpu.dot_dimension_numbers<[1], [0], [0], [1], [0, 0, 1, 1], [], []>} : vector<16x256xf32>, vector<256x128xf32>, vector<16x128xf32> -> vector<16x128xf32>
    %c0_19 = arith.constant 0 : index
    %c0_20 = arith.constant 0 : index
    %16 = vector.load %arg5[%c0_19, %c0_20] : memref<1x128xf32, #tpu.memory_space<vmem>>, vector<1x128xf32>
    %17 = vector.broadcast %16 : vector<1x128xf32> to vector<16x128xf32>
    %18 = arith.addf %15, %17 : vector<16x128xf32>
    %cst_21 = arith.constant 0.000000e+00 : f32
    %19 = vector.broadcast %cst_21 : f32 to vector<16x128xf32>
    %20 = arith.maximumf %18, %19 : vector<16x128xf32>
    %c0_22 = arith.constant 0 : index
    %c0_23 = arith.constant 0 : index
    %21 = vector.load %arg6[%c0_22, %c0_23] : memref<16x128xf32, #tpu.memory_space<vmem>>, vector<16x128xf32>
    tpu.vector_store %arg6[%c0_22, %c0_23], %20 {strides = array<i32>} : memref<16x128xf32, #tpu.memory_space<vmem>>, vector<16x128xf32>,
    return
  }
  func.func @transform_0(%arg0: i32) -> (i32, i32) {
    %c0_i32 = arith.constant 0 : i32
    %c0_i32_0 = arith.constant 0 : i32
    return %arg0, %c0_i32 : i32, i32
  }
  func.func @transform_1(%arg0: i32) -> (i32, i32) {
    %c0_i32 = arith.constant 0 : i32
    %c0_i32_0 = arith.constant 0 : i32
    %c0_i32_1 = arith.constant 0 : i32
    return %c0_i32, %c0_i32_0 : i32, i32
  }
  func.func @transform_2(%arg0: i32) -> (i32, i32) {
    %c0_i32 = arith.constant 0 : i32
    %c0_i32_0 = arith.constant 0 : i32
    %c0_i32_1 = arith.constant 0 : i32
    return %c0_i32, %c0_i32_0 : i32, i32
  }
  func.func @transform_3(%arg0: i32) -> (i32, i32) {
    %c0_i32 = arith.constant 0 : i32
    %c0_i32_0 = arith.constant 0 : i32
    %c0_i32_1 = arith.constant 0 : i32
    return %c0_i32, %c0_i32_0 : i32, i32
  }
  func.func @transform_4(%arg0: i32) -> (i32, i32) {
    %c0_i32 = arith.constant 0 : i32
    %c0_i32_0 = arith.constant 0 : i32
    %c0_i32_1 = arith.constant 0 : i32
    return %c0_i32, %c0_i32_0 : i32, i32
  }
  func.func @transform_5(%arg0: i32) -> (i32, i32) {
    %c0_i32 = arith.constant 0 : i32
    %c0_i32_0 = arith.constant 0 : i32
    return %arg0, %c0_i32 : i32, i32
  }
}

</mosaic_0001>

<bundles_post_ra>
// kernel: tpu_custom_call.1
= control target key start
LH: loop header
LB: loop body
LE: loop exit
PB: predicated region body
PF: predicated region fallthrough
CT: control target
= control target key end

     0   :  { %10 = vsyncpa [#allocation4], 0  ;;  %s685_s0 = inlined_call_operand.hbm [shape: f32[16,16], index: 0, kind: input, shape index: {}]   ;;  %s686_s1 = inlined_call_operand.hbm [shape: f32[128,128], index: 1, kind: input, shape index: {}]   ;;  %s687_s2 = inlined_call_operand.vmem [shape: f32[1,128], index: 2, kind: input, shape index: {}]   ;;  %s688_s3 = inlined_call_operand.hbm [shape: f32[256,128], index: 3, kind: input, shape index: {}]   ;;  %s689_s4 = inlined_call_operand.vmem [shape: f32[1,128], index: 4, kind: input, shape index: {}]   ;;  %s690_s5 = inlined_call_operand.hbm [shape: f32[16,128], index: 5, kind: output, shape index: {}]  }
   0x1   :  { %11 = vsyncpa [#allocation7], 0 }
   0x2   :  { %12 = vsyncpa [#allocation5], 0  ;;  %s571_s18 = smov [#allocation6]   ;;  %s572_s20 = smov [#allocation3]  }
   0x3   :  { %s30_s19 = sshll.u32 %s571_s18, 4  ;;  %s18_s21 = sshll.u32 %s572_s20, 4  ;;  %s31_s19 = int_to_ptr.vmem [resolvable:$true] %s30_s19  ;;  %s608_s21 = int_to_ptr.vmem [resolvable:$true] %s18_s21 }
   0x4   :  { %s477_s24 = scalar_lea.hbm %s686_s1, 2048 }
   0x5   :  { %p478_p0 = scmp.ne.s32.totalorder %s686_s1, %s477_s24  ;;  %p481_p1 = scmp.lt.u32.totalorder %s477_s24, %s686_s1 }
   0x7   :  { %p483_p2 = pnand %p481_p1, %p478_p0 }
   0x9   :  { %486 = shalt.err (!%p483_p2)
}
   0xa   :  { %s487_s29 = scalar_lea.vmem %s31_s19, 2048  ;;  %p492_p4 = scmp.lt.s32.totalorder %s31_s19, %s31_s19 }
   0xb   :  { %p488_p3 = scmp.ne.s32.totalorder %s31_s19, %s487_s29  ;;  %p493_p5 = scmp.lt.s32.totalorder %s487_s29, %s487_s29 }
   0xd   :  { %p494_p6 = por %p493_p5, %p492_p4 }
   0xf   :  { %p495_p7 = pnand %p494_p6, %p488_p3 }
  0x11   :  { %498 = shalt.err (!%p495_p7)
}
  0x12   :  { %s573_s30 = smov 128   ;;  %s574_s6 = smov 8  }
  0x13   :  { %36 = dma.hbm_to_vmem [thread:$0]  %s686_s1, 2048, %s31_s19, [#allocation7], %s573_s30, %s573_s30, %s574_s6  }
  0x14   :  { %s499_s11 = scalar_lea.hbm %s685_s0, 256 }
  0x15   :  { %p500_p8 = scmp.ne.s32.totalorder %s685_s0, %s499_s11  ;;  %p503_p9 = scmp.lt.u32.totalorder %s499_s11, %s685_s0 }
  0x17   :  { %p505_p10 = pnand %p503_p9, %p500_p8 }
  0x19   :  { %508 = shalt.err (!%p505_p10)
}
  0x1a   :  { %s509_s16 = scalar_lea.vmem %s608_s21, 256  ;;  %p514_p12 = scmp.lt.s32.totalorder %s608_s21, %s608_s21 }
  0x1b   :  { %p510_p11 = scmp.ne.s32.totalorder %s608_s21, %s509_s16  ;;  %p515_p13 = scmp.lt.s32.totalorder %s509_s16, %s509_s16 }
  0x1d   :  { %p516_p0 = por %p515_p13, %p514_p12 }
  0x1f   :  { %p517_p1 = pnand %p516_p0, %p510_p11 }
  0x21   :  { %520 = shalt.err (!%p517_p1)
}
  0x22   :  { %24 = dma.hbm_to_vmem [thread:$0]  %s685_s0, 256, %s608_s21, [#allocation4], %s573_s30, %s573_s30, %s574_s6  }
  0x23   :  { %s575_s18 = smov [#allocation8]   ;;  %s521_s23 = scalar_lea.hbm %s688_s3, 4096 }
  0x24   :  { %s44_s19 = sshll.u32 %s575_s18, 4  ;;  %p522_p2 = scmp.ne.s32.totalorder %s688_s3, %s521_s23  ;;  %s45_s19 = int_to_ptr.vmem [resolvable:$true] %s44_s19 }
  0x25   :  { %p525_p3 = scmp.lt.u32.totalorder %s521_s23, %s688_s3 }
  0x27   :  { %p527_p4 = pnand %p525_p3, %p522_p2 }
  0x29   :  { %530 = shalt.err (!%p527_p4)
}
  0x2a   :  { %s531_s28 = scalar_lea.vmem %s45_s19, 4096  ;;  %p536_p6 = scmp.lt.s32.totalorder %s45_s19, %s45_s19 }
  0x2b   :  { %p532_p5 = scmp.ne.s32.totalorder %s45_s19, %s531_s28  ;;  %p537_p7 = scmp.lt.s32.totalorder %s531_s28, %s531_s28 }
  0x2d   :  { %p538_p8 = por %p537_p7, %p536_p6 }
  0x2f   :  { %p539_p9 = pnand %p538_p8, %p532_p5 }
  0x31   :  { %542 = shalt.err (!%p539_p9)
}
  0x32   :  { %50 = dma.hbm_to_vmem [thread:$0]  %s688_s3, 4096, %s45_s19, [#allocation7], %s573_s30, %s573_s30, %s574_s6  }
  0x33   :  { %565 = dma.done.wait [#allocation4], 256  }
  0x34   :  { %566 = vsyncadd [#allocation4], 4294967040 }
  0x35   :  { %567 = dma.done.wait [#allocation7], 6144  }
  0x36   :  { %568 = vsyncadd [#allocation7], 4294961152  ;;  %v576_v0 = vmov 0.0   ;;  %v71_v1 = vld [vmem:[#allocation6] sm:$0xff]  ;;  %v72_v2 = vld [vmem:[#allocation6 + $0x8] sm:$0xff]  ;;  %vm66_vm0 = vcmask 130048  }
  0x37   :  { %64 = vst [vmem:[#allocation2] sm:$0xff] %v576_v0  ;;  %65 = vst [vmem:[#allocation2 + $0x10] sm:$0xff] %v576_v0  ;;  %v73_v3 = vld [vmem:[#allocation6 + $0x10] sm:$0xff]  ;;  %v406_v4 = vpack.c.bf16 %v72_v2, %v71_v1  ;;  %v74_v5 = vld [vmem:[#allocation6 + $0x18] sm:$0xff] }
  0x38   :  { %v410_v6 = vpack.c.bf16 %v74_v5, %v73_v3  ;;  %v75_v7 = vld [vmem:[#allocation6 + $0x20] sm:$0xff]  ;;  %v76_v8 = vld [vmem:[#allocation6 + $0x28] sm:$0xff]  ;;  %v77_v9 = vld [vmem:[#allocation6 + $0x30] sm:$0xff] }
  0x39   :  { %407 = vmatprep.subr.bf16.mxu0 %v406_v4  ;;  %v414_v10 = vpack.c.bf16 %v76_v8, %v75_v7  ;;  %v78_v11 = vld [vmem:[#allocation6 + $0x38] sm:$0xff]  ;;  %v62_v12 = vld [vmem:[#allocation3] sm:$0xff]  ;;  %v193_v14 = vld [vmem:[#allocation8 + $0x80] sm:$0xff] }
  0x3a   :  { %409 = vmatpush3.bf16.msra.mxu0 %v406_v4  ;;  %v63_v13 = vld [vmem:[#allocation3 + $0x8] sm:$0xff]  ;;  %67 = vst.msk [vmem:[#allocation2] sm:$0xff] %vm66_vm0, %v62_v12  ;;  %v194_v15 = vld [vmem:[#allocation8 + $0x88] sm:$0xff]  ;;  %v177_v16 = vld [vmem:[#allocation8] sm:$0xff]  ;;  %v418_v26 = vpack.c.bf16 %v78_v11, %v77_v9 }
  0x3b   :  { %411 = vmatprep.subr.bf16.mxu0 %v410_v6  ;;  %68 = vst.msk [vmem:[#allocation2 + $0x10] sm:$0xff] %vm66_vm0, %v63_v13  ;;  %v438_v17 = vpack.c.bf16 %v194_v15, %v193_v14  ;;  %v178_v18 = vld [vmem:[#allocation8 + $0x8] sm:$0xff]  ;;  %v195_v19 = vld [vmem:[#allocation8 + $0x90] sm:$0xff]  ;;  %v196_v20 = vld [vmem:[#allocation8 + $0x98] sm:$0xff] }
  0x3c   :  { %v440_v21 = vpack.c.bf16 %v178_v18, %v177_v16  ;;  %v442_v22 = vpack.c.bf16 %v196_v20, %v195_v19  ;;  %v179_v23 = vld [vmem:[#allocation8 + $0x10] sm:$0xff]  ;;  %v180_v24 = vld [vmem:[#allocation8 + $0x18] sm:$0xff]  ;;  %v197_v25 = vld [vmem:[#allocation8 + $0xa0] sm:$0xff] }
  0x3d   :  { %439 = vmatprep.subr.bf16.mxu1 %v438_v17  ;;  %v198_v27 = vld [vmem:[#allocation8 + $0xa8] sm:$0xff]  ;;  %v79_v28 = vld [vmem:[#allocation6 + $0x40] sm:$0xff]  ;;  %v444_v30 = vpack.c.bf16 %v180_v24, %v179_v23  ;;  %v199_v34 = vld [vmem:[#allocation8 + $0xb0] sm:$0xff] }
  0x3e   :  { %413 = vmatpush3.bf16.msra.mxu0 %v410_v6  ;;  %v80_v29 = vld [vmem:[#allocation6 + $0x48] sm:$0xff]  ;;  %441 = vmatpush3.bf16.msra.mxu1 %v440_v21  ;;  %v446_v31 = vpack.c.bf16 %v198_v27, %v197_v25  ;;  %v181_v32 = vld [vmem:[#allocation8 + $0x20] sm:$0xff]  ;;  %v200_v35 = vld [vmem:[#allocation8 + $0xb8] sm:$0xff] }
  0x3f   :  { %415 = vmatprep.subr.bf16.mxu0 %v414_v10  ;;  %443 = vmatprep.subr.bf16.mxu1 %v442_v22  ;;  %v182_v33 = vld [vmem:[#allocation8 + $0x28] sm:$0xff]  ;;  %v422_v36 = vpack.c.bf16 %v80_v29, %v79_v28  ;;  %v81_v38 = vld [vmem:[#allocation6 + $0x50] sm:$0xff]  ;;  %v82_v39 = vld [vmem:[#allocation6 + $0x58] sm:$0xff]  ;;  %v450_v41 = vpack.c.bf16 %v200_v35, %v199_v34 }
  0x40   :  { %v448_v40 = vpack.c.bf16 %v182_v33, %v181_v32  ;;  %v183_v42 = vld [vmem:[#allocation8 + $0x30] sm:$0xff]  ;;  %v184_v43 = vld [vmem:[#allocation8 + $0x38] sm:$0xff]  ;;  %v201_v44 = vld [vmem:[#allocation8 + $0xc0] sm:$0xff]  ;;  %v426_v46 = vpack.c.bf16 %v82_v39, %v81_v38 }
  0x41   :  { %v660_v37 = vld [vmem:[#allocation2] sm:$0xff]  ;;  %v202_v45 = vld [vmem:[#allocation8 + $0xc8] sm:$0xff]  ;;  %v83_v47 = vld [vmem:[#allocation6 + $0x60] sm:$0xff]  ;;  %v452_v49 = vpack.c.bf16 %v184_v43, %v183_v42 }
  0x42   :  { %417 = vmatpush3.bf16.msra.mxu0 %v414_v10  ;;  %403 = vmatprep.mubr.f32.mxu0 %v660_v37  ;;  %v84_v48 = vld [vmem:[#allocation6 + $0x68] sm:$0xff]  ;;  %v454_v50 = vpack.c.bf16 %v202_v45, %v201_v44  ;;  %v85_v52 = vld [vmem:[#allocation6 + $0x70] sm:$0xff]  ;;  %v86_v53 = vld [vmem:[#allocation6 + $0x78] sm:$0xff] }
  0x43   :  { %419 = vmatprep.subr.bf16.mxu0 %v418_v26  ;;  %445 = vmatpush3.bf16.msra.mxu1 %v444_v30  ;;  %v430_v51 = vpack.c.bf16 %v84_v48, %v83_v47  ;;  %v434_v54 = vpack.c.bf16 %v86_v53, %v85_v52  ;;  %v70_v55 = vld [vmem:[#allocation2 + $0x10] sm:$0xff]  ;;  %v186_v57 = vld [vmem:[#allocation8 + $0x48] sm:$0xff]  ;;  %v203_v59 = vld [vmem:[#allocation8 + $0xd0] sm:$0xff] }
  0x44   :  { %447 = vmatprep.subr.bf16.mxu1 %v446_v31  ;;  %v185_v56 = vld [vmem:[#allocation8 + $0x40] sm:$0xff]  ;;  %v204_v60 = vld [vmem:[#allocation8 + $0xd8] sm:$0xff]  ;;  %v187_v62 = vld [vmem:[#allocation8 + $0x50] sm:$0xff] }
  0x45   :  { %v456_v58 = vpack.c.bf16 %v186_v57, %v185_v56  ;;  %v458_v61 = vpack.c.bf16 %v204_v60, %v203_v59  ;;  %v188_v63 = vld [vmem:[#allocation8 + $0x58] sm:$0xff]  ;;  %v205_v1 = vld [vmem:[#allocation8 + $0xe0] sm:$0xff]  ;;  %v206_v2 = vld [vmem:[#allocation8 + $0xe8] sm:$0xff] }
  0x46   :  { %421 = vmatpush3.bf16.msra.mxu0 %v418_v26  ;;  %v460_v0 = vpack.c.bf16 %v188_v63, %v187_v62  ;;  %v462_v3 = vpack.c.bf16 %v206_v2, %v205_v1  ;;  %v189_v4 = vld [vmem:[#allocation8 + $0x60] sm:$0xff]  ;;  %v190_v5 = vld [vmem:[#allocation8 + $0x68] sm:$0xff]  ;;  %v207_v7 = vld [vmem:[#allocation8 + $0xf0] sm:$0xff] }
  0x47   :  { %423 = vmatprep.subr.bf16.mxu0 %v422_v36  ;;  %449 = vmatpush3.bf16.msra.mxu1 %v448_v40  ;;  %v464_v6 = vpack.c.bf16 %v190_v5, %v189_v4  ;;  %v208_v8 = vld [vmem:[#allocation8 + $0xf8] sm:$0xff]  ;;  %v191_v10 = vld [vmem:[#allocation8 + $0x70] sm:$0xff] }
  0x48   :  { %451 = vmatprep.subr.bf16.mxu1 %v450_v41  ;;  %v466_v9 = vpack.c.bf16 %v208_v8, %v207_v7  ;;  %v192_v11 = vld [vmem:[#allocation8 + $0x78] sm:$0xff]  ;;  %v313_v13 = vld [vmem:[%s687_s2] ss:$0 sm:$0xff]  ;;  %s577_s2 = smov [#allocation9]  }
  0x49   :  { %v468_v12 = vpack.c.bf16 %v192_v11, %v191_v10  ;;  %v314_v21 = vld [vmem:[%s689_s4] ss:$0 sm:$0xff]  ;;  %s300_s9 = sshll.u32 %s577_s2, 4  ;;  %s301_s9 = int_to_ptr.vmem [resolvable:$true] %s300_s9 }
  0x4a   :  { %425 = vmatpush3.bf16.msra.mxu0 %v422_v36  ;;  %s543_s10 = scalar_lea.vmem %s301_s9, 256  ;;  %p548_p11 = scmp.lt.s32.totalorder %s301_s9, %s301_s9 }
  0x4b   :  { %427 = vmatprep.subr.bf16.mxu0 %v426_v46  ;;  %453 = vmatpush3.bf16.msra.mxu1 %v452_v49  ;;  %p544_p10 = scmp.ne.s32.totalorder %s301_s9, %s543_s10  ;;  %p549_p12 = scmp.lt.s32.totalorder %s543_s10, %s543_s10 }
  0x4c   :  { %455 = vmatprep.subr.bf16.mxu1 %v454_v50 }
  0x4d   :  { %p550_p13 = por %p549_p12, %p548_p11 }
  0x4e   :  { %429 = vmatpush3.bf16.msra.mxu0 %v426_v46 }
  0x4f   :  { %431 = vmatprep.subr.bf16.mxu0 %v430_v51  ;;  %457 = vmatpush3.bf16.msra.mxu1 %v456_v58  ;;  %p551_p0 = pnand %p550_p13, %p544_p10 }
  0x50   :  { %459 = vmatprep.subr.bf16.mxu1 %v458_v61 }
  0x52   :  { %433 = vmatpush3.bf16.msra.mxu0 %v430_v51 }
  0x53   :  { %435 = vmatprep.subr.bf16.mxu0 %v434_v54  ;;  %461 = vmatpush3.bf16.msra.mxu1 %v460_v0 }
  0x54   :  { %463 = vmatprep.subr.bf16.mxu1 %v462_v3 }
  0x56   :  { %437 = vmatpush3.bf16.msra.mxu0 %v434_v54 }
  0x57   :  { %465 = vmatpush3.bf16.msra.mxu1 %v464_v6 }
  0x58   :  { %467 = vmatprep.subr.bf16.mxu1 %v466_v9 }
  0x59   :  { %404 = vmatmul.mubr.f32.vlgmr.msra.gmra.mrb[0].mxu0 %v70_v55 }
  0x5b   :  { %469 = vmatpush3.bf16.msra.mxu1 %v468_v12 }
 0x12c   :  { %v405_v14 = vpop.f32.mrb[0].mxu0 }
 0x12d   :  { %v166_v15 = vadd.f32 %v405_v14, %v313_v13  ;;  %v160_v16 = vpop.f32.mrb[1].mxu0 }
 0x12e   :  { %v161_v17 = vadd.f32 %v313_v13, %v160_v16 }
 0x12f   :  { %v170_v18 = vmax.f32 %v166_v15, 0.0 }
 0x130   :  { %v169_v19 = vmax.f32 %v161_v17, 0.0 }
 0x132   :  { %280 = vmatprep.mubr.f32.mxu1 %v169_v19 }
 0x133   :  { %281 = vmatmul.mubr.f32.vlgmr.msra.gmra.mrb[0].mxu1 %v660_v37 }
 0x134   :  { %285 = vmatprep.mubr.f32.mxu1 %v170_v18 }
 0x137   :  { %286 = vmatmul.mubr.f32.gmra.mrb[2].mxu1 %v70_v55 }
 0x206   :  { %v365_v20 = vpop.f32.mrb[0].mxu1 }
 0x207   :  { %v366_v22 = vpop.f32.mrb[1].mxu1 }
 0x208   :  { %v367_v23 = vadd.f32 %v366_v22, %v365_v20 }
 0x20a   :  { %v283_v24 = vadd.f32 %v367_v23, %v314_v21  ;;  %v368_v25 = vpop.f32.mrb[2].mxu1 }
 0x20b   :  { %v369_v26 = vpop.f32.mrb[3].mxu1 }
 0x20c   :  { %v291_v27 = vmax.f32 %v283_v24, 0.0  ;;  %v370_v28 = vadd.f32 %v369_v26, %v368_v25 }
 0x20e   :  { %293 = vst [vmem:[#allocation9] sm:$0xff] %v291_v27  ;;  %v288_v29 = vadd.f32 %v370_v28, %v314_v21 }
 0x210   :  { %v292_v30 = vmax.f32 %v288_v29, 0.0 }
 0x212   :  { %294 = vst [vmem:[#allocation9 + $0x8] sm:$0xff] %v292_v30 }
 0x213   :  { %554 = shalt.err (!%p551_p0)
}
 0x214   :  { %s555_s12 = scalar_lea.hbm %s690_s5, 256 }
 0x215   :  { %p556_p1 = scmp.ne.s32.totalorder %s690_s5, %s555_s12  ;;  %p559_p2 = scmp.lt.u32.totalorder %s555_s12, %s690_s5 }
 0x217   :  { %p561_p3 = pnand %p559_p2, %p556_p1 }
 0x219   :  { %564 = shalt.err (!%p561_p3)
}
 0x21a   :  { %306 = dma.vmem_to_hbm [thread:$0]  %s301_s9, 256, %s690_s5, [#allocation5], %s573_s30, %s573_s30, %s574_s6  }
 0x21b   :  { %569 = dma.done.wait [#allocation5], 256  }
 0x21c   :  { %570 = vsyncadd [#allocation5], 4294967040 }
 0x21d   :  { %310 = vsyncpa [#allocation4], 1 }
 0x21e   :  { %311 = vsyncpa [#allocation7], 1 }
 0x21f   :  { %312 = vsyncpa [#allocation5], 1 }

</bundles_post_ra>
